<compile_context>
chip_gen: v7x
topology: tpu7x:2x2x1
jax: 0.10.0
libtpu: 0.0.40
codegen_flags: <defaults>
</compile_context>

<pallas_src>
import functools

import jax
import jax.numpy as jnp
from jax.experimental import pallas as pl
from jax.experimental.pallas import tpu as pltpu

# Module constants (defaults of HSVLoss.__init__)
H_T, S_T, V_T = 0.0, 1.0, 0.7
EPS = 1e-7
THRESH_H = 0.03
THRESH_SV = 0.1

_LANES = 128
_SUBLANES = 8


def _recip(x):
    """EUP approximate reciprocal + one Newton step (~f32 accurate)."""
    inv = pl.reciprocal(x, approx=True)
    return inv * (2.0 - x * inv)


def _hsv_partial_kernel(x_ref, out_ref, *, tr, pix_valid, last_ri, need_mask):
    ri = pl.program_id(1)

    @pl.when(ri == 0)
    def _init():
        out_ref[...] = jnp.zeros_like(out_ref)

    # Raw channel values; the affine img = 0.5*x + 0.5 is folded out:
    # hue ratios are affine-invariant (eps doubles), sat/value handled below.
    xr = x_ref[0, 0].astype(jnp.float32)
    xg = x_ref[0, 1].astype(jnp.float32)
    xb = x_ref[0, 2].astype(jnp.float32)

    mx = jnp.maximum(jnp.maximum(xr, xg), xb)
    mn = jnp.minimum(jnp.minimum(xr, xg), xb)
    d = mx - mn
    inv_d = _recip(d + 2.0 * EPS)

    # Same override order as the PyTorch code: blue -> green -> red -> (mn==mx)
    hue = jnp.where(xb == mx, 4.0 + (xr - xg) * inv_d, 0.0)
    hue = jnp.where(xg == mx, 2.0 + (xb - xr) * inv_d, hue)
    t = (xg - xb) * inv_d            # |t| < 1, so mod(t, 6) == where(t<0, t+6, t)
    t = jnp.where(t < 0.0, t + 6.0, t)
    hue = jnp.where(xr == mx, t, hue)
    hue = jnp.where(mn == mx, 0.0, hue)
    hue = hue * jnp.float32(1.0 / 6.0)

    # hue >= 0  ->  |hue - 0| == hue
    loss_h = jnp.where(hue < THRESH_H, 0.0, hue)

    # sat in [0, 1) for inputs in [-1, 1]  ->  |sat - 1| == 1 - sat.
    # img.max == 0  <=>  raw max == -1 (exact under the affine).
    sat = d * _recip(mx + (1.0 + 2.0 * EPS))
    sat = jnp.where(mx == -1.0, 0.0, sat)
    loss_s = 1.0 - sat

    # |0.5*mx + 0.5 - 0.7| == 0.5 * |mx - 0.4|; the 0.5 is applied at finalize.
    loss_v = jnp.abs(mx - jnp.float32(2.0 * V_T - 1.0))

    def vreg_partial(m):
        # (tr,128) -> (tr/8, 8, 128), reduce the leading axis: pure VPU adds,
        # no XLU work on the hot path.
        return jnp.sum(m.reshape(tr // _SUBLANES, _SUBLANES, _LANES), axis=0)

    def accumulate(lh, ls, lv):
        out_ref[0, 0] += vreg_partial(lh)
        out_ref[0, 1] += vreg_partial(ls)
        out_ref[0, 2] += vreg_partial(lv)

    if need_mask:
        # All padded / out-of-bounds pixels live in the final row tile, so the
        # mask (iota + compare + selects) is paid only there.
        @pl.when(ri != last_ri)
        def _hot():
            accumulate(loss_h, loss_s, loss_v)

        @pl.when(ri == last_ri)
        def _tail():
            row = jax.lax.broadcasted_iota(jnp.int32, loss_h.shape, 0)
            lane = jax.lax.broadcasted_iota(jnp.int32, loss_h.shape, 1)
            pix = (ri * tr + row) * _LANES + lane
            valid = pix < pix_valid
            # Keep the select form (not multiply-by-mask): OOB rows may hold
            # garbage / NaN from past-the-end reads.
            accumulate(jnp.where(valid, loss_h, 0.0),
                       jnp.where(valid, loss_s, 0.0),
                       jnp.where(valid, loss_v, 0.0))
    else:
        accumulate(loss_h, loss_s, loss_v)


def hsv_loss(x, *, row_tile=1024):
    """x: (N, 3, H, W) float (f32/bf16/f16), values in [-1, 1]. Scalar f32 loss."""
    n, c, h, w = x.shape
    assert c == 3, "HSVLoss expects a 3-channel (RGB) NCHW input"
    p = h * w
    n_pix = float(n * p)

    # Lane-dense layout: flatten pixels, pad to a multiple of 8*128 so the
    # (rows, 128) view is always dense and rows % 8 == 0 (kernel reshape).
    align = _SUBLANES * _LANES
    p_pad = ((p + align - 1) // align) * align
    x3 = x.reshape(n, c, p)
    if p_pad != p:
        x3 = jnp.pad(x3, ((0, 0), (0, 0), (0, p_pad - p)))
    rows = p_pad // _LANES
    x4 = x3.reshape(n, c, rows, _LANES)

    # Row tile: multiple of 16 (bf16-native sublane packing); 1024 rows of f32
    # = 1.5 MiB/block (3 MiB double-buffered) -- safe even under v5e's 16 MiB
    # scoped-VMEM default, and big enough to amortize per-step overhead.
    row_tile = max(16, (row_tile // 16) * 16)
    tr = rows if rows <= row_tile else row_tile
    num_r = pl.cdiv(rows, tr)
    need_mask = (p_pad != p) or (rows % tr != 0)

    kernel = functools.partial(
        _hsv_partial_kernel,
        tr=tr, pix_valid=p, last_ri=num_r - 1, need_mask=need_mask)

    partials = pl.pallas_call(
        kernel,
        out_shape=jax.ShapeDtypeStruct((n, 3, _SUBLANES, _LANES), jnp.float32),
        grid_spec=pltpu.PrefetchScalarGridSpec(
            num_scalar_prefetch=0,
            grid=(n, num_r),
            in_specs=[
                pl.BlockSpec((1, 3, tr, _LANES), lambda ni, ri: (ni, 0, ri, 0)),
            ],
            # Per-batch partial-sum block, resident across the row-tile axis.
            out_specs=pl.BlockSpec((1, 3, _SUBLANES, _LANES),
                                   lambda ni, ri: (ni, 0, 0, 0)),
        ),
        compiler_params=pltpu.CompilerParams(
            # N axis parallel -> v7x megacore can split batches across cores;
            # row-tile axis is the sequential reduction.
            dimension_semantics=("parallel", "arbitrary")),
    )(x4)

    # Tiny finalize in plain JAX: cross-lane collapse + global thresholds/gates
    # of the module (the torch `.item()` branches), applied to full sums only.
    sums = jnp.sum(partials, axis=(0, 2, 3))            # (3,) f32
    loss_h = sums[0] / n_pix
    loss_h = jnp.where(loss_h < THRESH_H * 3.0, 0.0, loss_h)
    gate = loss_h > THRESH_SV
    loss_s = jnp.where(gate, 0.0, sums[1] / n_pix)
    loss_v = jnp.where(gate, 0.0, 0.5 * sums[2] / n_pix)
    return loss_h + 0.4 * loss_s + 0.4 * loss_v


def hsv_loss_ref(x):
    """Pure-JAX reference mirroring the PyTorch forward, for sanity checking."""
    img = x.astype(jnp.float32) * 0.5 + 0.5
    r, g, b = img[:, 0], img[:, 1], img[:, 2]
    mx = jnp.maximum(jnp.maximum(r, g), b)
    mn = jnp.minimum(jnp.minimum(r, g), b)
    denom = mx - mn + EPS

    hue = jnp.zeros_like(mx)
    hue = jnp.where(b == mx, 4.0 + (r - g) / denom, hue)
    hue = jnp.where(g == mx, 2.0 + (b - r) / denom, hue)
    hue = jnp.where(r == mx, jnp.mod((g - b) / denom, 6.0), hue)
    hue = jnp.where(mn == mx, 0.0, hue)
    hue = hue / 6.0
    sat = (mx - mn) / (mx + EPS)
    sat = jnp.where(mx == 0.0, 0.0, sat)
    val = mx

    n_pix = hue.size
    lh = jnp.abs(hue - H_T)
    lh = jnp.where(lh < THRESH_H, 0.0, lh)
    loss_h = jnp.sum(lh) / n_pix
    loss_h = jnp.where(loss_h < THRESH_H * 3, 0.0, loss_h)
    loss_s = jnp.sum(jnp.abs(sat - S_T)) / n_pix
    loss_v = jnp.sum(jnp.abs(val - V_T)) / n_pix
    gate = loss_h > THRESH_SV
    loss_s = jnp.where(gate, 0.0, loss_s)
    loss_v = jnp.where(gate, 0.0, loss_v)
    return loss_h + 0.4 * loss_s + 0.4 * loss_v


if __name__ == "__main__":
    key = jax.random.PRNGKey(0)
    # Small deterministic input in [-1, 1] (tanh-style images), NCHW with C=3.
    x = jax.random.uniform(key, (2, 3, 16, 16), dtype=jnp.float32,
                           minval=-1.0, maxval=1.0)

    out = hsv_loss(x)
    jax.block_until_ready(out)

    ref = hsv_loss_ref(x)
    assert jnp.allclose(out, ref, atol=1e-5, rtol=1e-4), (out, ref)

    print("KERNEL_OK")
</pallas_src>

<mosaic_0001>
module attributes {stable_mosaic.version = 11 : i64} {
  func.func @_hsv_partial_kernel(%arg0: i32, %arg1: i32, %arg2: memref<1x3x8x128xf32, #tpu.memory_space<vmem>>, %arg3: memref<1x3x8x128xf32, #tpu.memory_space<vmem>>) attributes {dimension_semantics = [#tpu.dimension_semantics<parallel>, #tpu.dimension_semantics<arbitrary>], iteration_bounds = array<i64: 2, 1>, scalar_prefetch = 0 : i64, scratch_operands = 0 : i64, tpu.core_type = #tpu.core_type<tc>, window_params = [{transform_indices = @transform_0, window_bounds = array<i64: 1, 3, 8, 128>}, {transform_indices = @transform_1, window_bounds = array<i64: 1, 3, 8, 128>}]} {
    %c0_i32 = arith.constant 0 : i32
    %0 = arith.cmpi eq, %arg1, %c0_i32 : i32
    %1 = arith.extui %0 : i1 to i32
    %c0_i32_0 = arith.constant 0 : i32
    %2 = arith.cmpi ne, %1, %c0_i32_0 : i32
    scf.if %2 {
      %cst_30 = arith.constant 0.000000e+00 : f32
      %75 = vector.broadcast %cst_30 : f32 to vector<1x3x8x128xf32>
      %c0_31 = arith.constant 0 : index
      %c0_32 = arith.constant 0 : index
      %c0_33 = arith.constant 0 : index
      %c0_34 = arith.constant 0 : index
      %76 = vector.load %arg3[%c0_31, %c0_32, %c0_33, %c0_34] : memref<1x3x8x128xf32, #tpu.memory_space<vmem>>, vector<1x3x8x128xf32>
      tpu.vector_store %arg3[%c0_31, %c0_32, %c0_33, %c0_34], %75 {strides = array<i32>} : memref<1x3x8x128xf32, #tpu.memory_space<vmem>>, vector<1x3x8x128xf32>,
    } else {
    }
    %c0 = arith.constant 0 : index
    %c0_1 = arith.constant 0 : index
    %c0_2 = arith.constant 0 : index
    %c0_3 = arith.constant 0 : index
    %3 = vector.load %arg2[%c0, %c0_1, %c0_2, %c0_3] : memref<1x3x8x128xf32, #tpu.memory_space<vmem>>, vector<1x1x8x128xf32>
    %4 = vector.shape_cast %3 : vector<1x1x8x128xf32> to vector<8x128xf32>
    %c0_4 = arith.constant 0 : index
    %c1 = arith.constant 1 : index
    %c0_5 = arith.constant 0 : index
    %c0_6 = arith.constant 0 : index
    %5 = vector.load %arg2[%c0_4, %c1, %c0_5, %c0_6] : memref<1x3x8x128xf32, #tpu.memory_space<vmem>>, vector<1x1x8x128xf32>
    %6 = vector.shape_cast %5 : vector<1x1x8x128xf32> to vector<8x128xf32>
    %c0_7 = arith.constant 0 : index
    %c2 = arith.constant 2 : index
    %c0_8 = arith.constant 0 : index
    %c0_9 = arith.constant 0 : index
    %7 = vector.load %arg2[%c0_7, %c2, %c0_8, %c0_9] : memref<1x3x8x128xf32, #tpu.memory_space<vmem>>, vector<1x1x8x128xf32>
    %8 = vector.shape_cast %7 : vector<1x1x8x128xf32> to vector<8x128xf32>
    %9 = arith.maximumf %4, %6 : vector<8x128xf32>
    %10 = arith.maximumf %9, %8 : vector<8x128xf32>
    %11 = arith.minimumf %4, %6 : vector<8x128xf32>
    %12 = arith.minimumf %11, %8 : vector<8x128xf32>
    %13 = arith.subf %10, %12 : vector<8x128xf32>
    %cst = arith.constant 2.000000e-07 : f32
    %14 = vector.broadcast %cst : f32 to vector<8x128xf32>
    %15 = arith.addf %13, %14 : vector<8x128xf32>
    %16 = tpu.reciprocal %15 {approx = true} : vector<8x128xf32> -> vector<8x128xf32>
    %17 = arith.mulf %15, %16 : vector<8x128xf32>
    %cst_10 = arith.constant 2.000000e+00 : f32
    %18 = vector.broadcast %cst_10 : f32 to vector<8x128xf32>
    %19 = arith.subf %18, %17 : vector<8x128xf32>
    %20 = arith.mulf %16, %19 : vector<8x128xf32>
    %21 = arith.cmpf oeq, %8, %10 : vector<8x128xf32>
    %22 = arith.subf %4, %6 : vector<8x128xf32>
    %23 = arith.mulf %22, %20 : vector<8x128xf32>
    %cst_11 = arith.constant 4.000000e+00 : f32
    %24 = vector.broadcast %cst_11 : f32 to vector<8x128xf32>
    %25 = arith.addf %24, %23 : vector<8x128xf32>
    %cst_12 = arith.constant 0.000000e+00 : f32
    %26 = vector.broadcast %cst_12 : f32 to vector<8x128xf32>
    %27 = arith.select %21, %25, %26 : vector<8x128xi1>, vector<8x128xf32>
    %28 = arith.cmpf oeq, %6, %10 : vector<8x128xf32>
    %29 = arith.subf %8, %4 : vector<8x128xf32>
    %30 = arith.mulf %29, %20 : vector<8x128xf32>
    %cst_13 = arith.constant 2.000000e+00 : f32
    %31 = vector.broadcast %cst_13 : f32 to vector<8x128xf32>
    %32 = arith.addf %31, %30 : vector<8x128xf32>
    %33 = arith.select %28, %32, %27 : vector<8x128xi1>, vector<8x128xf32>
    %34 = arith.subf %6, %8 : vector<8x128xf32>
    %35 = arith.mulf %34, %20 : vector<8x128xf32>
    %cst_14 = arith.constant 0.000000e+00 : f32
    %36 = vector.broadcast %cst_14 : f32 to vector<8x128xf32>
    %37 = arith.cmpf olt, %35, %36 : vector<8x128xf32>
    %cst_15 = arith.constant 6.000000e+00 : f32
    %38 = vector.broadcast %cst_15 : f32 to vector<8x128xf32>
    %39 = arith.addf %35, %38 : vector<8x128xf32>
    %40 = arith.select %37, %39, %35 : vector<8x128xi1>, vector<8x128xf32>
    %41 = arith.cmpf oeq, %4, %10 : vector<8x128xf32>
    %42 = arith.select %41, %40, %33 : vector<8x128xi1>, vector<8x128xf32>
    %43 = arith.cmpf oeq, %12, %10 : vector<8x128xf32>
    %cst_16 = arith.constant 0.000000e+00 : f32
    %44 = vector.broadcast %cst_16 : f32 to vector<8x128xf32>
    %45 = arith.select %43, %44, %42 : vector<8x128xi1>, vector<8x128xf32>
    %cst_17 = arith.constant 0.166666672 : f32
    %46 = vector.broadcast %cst_17 : f32 to vector<8x128xf32>
    %47 = arith.mulf %45, %46 : vector<8x128xf32>
    %cst_18 = arith.constant 3.000000e-02 : f32
    %48 = vector.broadcast %cst_18 : f32 to vector<8x128xf32>
    %49 = arith.cmpf olt, %47, %48 : vector<8x128xf32>
    %cst_19 = arith.constant 0.000000e+00 : f32
    %50 = vector.broadcast %cst_19 : f32 to vector<8x128xf32>
    %51 = arith.select %49, %50, %47 : vector<8x128xi1>, vector<8x128xf32>
    %cst_20 = arith.constant 1.00000024 : f32
    %52 = vector.broadcast %cst_20 : f32 to vector<8x128xf32>
    %53 = arith.addf %10, %52 : vector<8x128xf32>
    %54 = tpu.reciprocal %53 {approx = true} : vector<8x128xf32> -> vector<8x128xf32>
    %55 = arith.mulf %53, %54 : vector<8x128xf32>
    %cst_21 = arith.constant 2.000000e+00 : f32
    %56 = vector.broadcast %cst_21 : f32 to vector<8x128xf32>
    %57 = arith.subf %56, %55 : vector<8x128xf32>
    %58 = arith.mulf %54, %57 : vector<8x128xf32>
    %59 = arith.mulf %13, %58 : vector<8x128xf32>
    %cst_22 = arith.constant -1.000000e+00 : f32
    %60 = vector.broadcast %cst_22 : f32 to vector<8x128xf32>
    %61 = arith.cmpf oeq, %10, %60 : vector<8x128xf32>
    %cst_23 = arith.constant 0.000000e+00 : f32
    %62 = vector.broadcast %cst_23 : f32 to vector<8x128xf32>
    %63 = arith.select %61, %62, %59 : vector<8x128xi1>, vector<8x128xf32>
    %cst_24 = arith.constant 1.000000e+00 : f32
    %64 = vector.broadcast %cst_24 : f32 to vector<8x128xf32>
    %65 = arith.subf %64, %63 : vector<8x128xf32>
    %cst_25 = arith.constant 4.000000e-01 : f32
    %66 = vector.broadcast %cst_25 : f32 to vector<8x128xf32>
    %67 = arith.subf %10, %66 : vector<8x128xf32>
    %68 = math.absf %67 : vector<8x128xf32>
    %c0_i32_26 = arith.constant 0 : i32
    %69 = arith.cmpi ne, %arg1, %c0_i32_26 : i32
    %70 = arith.extui %69 : i1 to i32
    %c0_i32_27 = arith.constant 0 : i32
    %71 = arith.cmpi ne, %70, %c0_i32_27 : i32
    scf.if %71 {
      %c0_30 = arith.constant 0 : index
      %c0_31 = arith.constant 0 : index
      %c0_32 = arith.constant 0 : index
      %c0_33 = arith.constant 0 : index
      %75 = vector.load %arg3[%c0_30, %c0_31, %c0_32, %c0_33] : memref<1x3x8x128xf32, #tpu.memory_space<vmem>>, vector<1x1x8x128xf32>
      %76 = vector.shape_cast %75 : vector<1x1x8x128xf32> to vector<8x128xf32>
      %77 = vector.shape_cast %51 : vector<8x128xf32> to vector<1x8x128xf32>
      %cst_34 = arith.constant dense<0.000000e+00> : vector<8x128xf32>
      %78 = vector.multi_reduction <add>, %77, %cst_34 [0] : vector<1x8x128xf32> to vector<8x128xf32>
      %79 = arith.addf %76, %78 : vector<8x128xf32>
      %c0_35 = arith.constant 0 : index
      %c0_36 = arith.constant 0 : index
      %c0_37 = arith.constant 0 : index
      %c0_38 = arith.constant 0 : index
      %80 = vector.load %arg3[%c0_35, %c0_36, %c0_37, %c0_38] : memref<1x3x8x128xf32, #tpu.memory_space<vmem>>, vector<1x1x8x128xf32>
      %81 = vector.shape_cast %80 : vector<1x1x8x128xf32> to vector<8x128xf32>
      %82 = vector.shape_cast %79 : vector<8x128xf32> to vector<1x1x8x128xf32>
      tpu.vector_store %arg3[%c0_35, %c0_36, %c0_37, %c0_38], %82 {strides = array<i32>} : memref<1x3x8x128xf32, #tpu.memory_space<vmem>>, vector<1x1x8x128xf32>,
      %c0_39 = arith.constant 0 : index
      %c1_40 = arith.constant 1 : index
      %c0_41 = arith.constant 0 : index
      %c0_42 = arith.constant 0 : index
      %83 = vector.load %arg3[%c0_39, %c1_40, %c0_41, %c0_42] : memref<1x3x8x128xf32, #tpu.memory_space<vmem>>, vector<1x1x8x128xf32>
      %84 = vector.shape_cast %83 : vector<1x1x8x128xf32> to vector<8x128xf32>
      %85 = vector.shape_cast %65 : vector<8x128xf32> to vector<1x8x128xf32>
      %cst_43 = arith.constant dense<0.000000e+00> : vector<8x128xf32>
      %86 = vector.multi_reduction <add>, %85, %cst_43 [0] : vector<1x8x128xf32> to vector<8x128xf32>
      %87 = arith.addf %84, %86 : vector<8x128xf32>
      %c0_44 = arith.constant 0 : index
      %c1_45 = arith.constant 1 : index
      %c0_46 = arith.constant 0 : index
      %c0_47 = arith.constant 0 : index
      %88 = vector.load %arg3[%c0_44, %c1_45, %c0_46, %c0_47] : memref<1x3x8x128xf32, #tpu.memory_space<vmem>>, vector<1x1x8x128xf32>
      %89 = vector.shape_cast %88 : vector<1x1x8x128xf32> to vector<8x128xf32>
      %90 = vector.shape_cast %87 : vector<8x128xf32> to vector<1x1x8x128xf32>
      tpu.vector_store %arg3[%c0_44, %c1_45, %c0_46, %c0_47], %90 {strides = array<i32>} : memref<1x3x8x128xf32, #tpu.memory_space<vmem>>, vector<1x1x8x128xf32>,
      %c0_48 = arith.constant 0 : index
      %c2_49 = arith.constant 2 : index
      %c0_50 = arith.constant 0 : index
      %c0_51 = arith.constant 0 : index
      %91 = vector.load %arg3[%c0_48, %c2_49, %c0_50, %c0_51] : memref<1x3x8x128xf32, #tpu.memory_space<vmem>>, vector<1x1x8x128xf32>
      %92 = vector.shape_cast %91 : vector<1x1x8x128xf32> to vector<8x128xf32>
      %93 = vector.shape_cast %68 : vector<8x128xf32> to vector<1x8x128xf32>
      %cst_52 = arith.constant dense<0.000000e+00> : vector<8x128xf32>
      %94 = vector.multi_reduction <add>, %93, %cst_52 [0] : vector<1x8x128xf32> to vector<8x128xf32>
      %95 = arith.addf %92, %94 : vector<8x128xf32>
      %c0_53 = arith.constant 0 : index
      %c2_54 = arith.constant 2 : index
      %c0_55 = arith.constant 0 : index
      %c0_56 = arith.constant 0 : index
      %96 = vector.load %arg3[%c0_53, %c2_54, %c0_55, %c0_56] : memref<1x3x8x128xf32, #tpu.memory_space<vmem>>, vector<1x1x8x128xf32>
      %97 = vector.shape_cast %96 : vector<1x1x8x128xf32> to vector<8x128xf32>
      %98 = vector.shape_cast %95 : vector<8x128xf32> to vector<1x1x8x128xf32>
      tpu.vector_store %arg3[%c0_53, %c2_54, %c0_55, %c0_56], %98 {strides = array<i32>} : memref<1x3x8x128xf32, #tpu.memory_space<vmem>>, vector<1x1x8x128xf32>,
    } else {
    }
    %c0_i32_28 = arith.constant 0 : i32
    %72 = arith.cmpi eq, %arg1, %c0_i32_28 : i32
    %73 = arith.extui %72 : i1 to i32
    %c0_i32_29 = arith.constant 0 : i32
    %74 = arith.cmpi ne, %73, %c0_i32_29 : i32
    scf.if %74 {
      %75 = tpu.iota {dimensions = array<i32: 0>} : vector<8x128xi32>
      %76 = tpu.iota {dimensions = array<i32: 1>} : vector<8x128xi32>
      %c8_i32 = arith.constant 8 : i32
      %77 = arith.muli %arg1, %c8_i32 : i32
      %78 = vector.broadcast %77 : i32 to vector<8x128xi32>
      %79 = arith.addi %78, %75 : vector<8x128xi32>
      %c128_i32 = arith.constant 128 : i32
      %80 = vector.broadcast %c128_i32 : i32 to vector<8x128xi32>
      %81 = arith.muli %79, %80 : vector<8x128xi32>
      %82 = arith.addi %81, %76 : vector<8x128xi32>
      %c256_i32 = arith.constant 256 : i32
      %83 = vector.broadcast %c256_i32 : i32 to vector<8x128xi32>
      %84 = arith.cmpi slt, %82, %83 : vector<8x128xi32>
      %cst_30 = arith.constant 0.000000e+00 : f32
      %85 = vector.broadcast %cst_30 : f32 to vector<8x128xf32>
      %86 = arith.select %84, %51, %85 : vector<8x128xi1>, vector<8x128xf32>
      %cst_31 = arith.constant 0.000000e+00 : f32
      %87 = vector.broadcast %cst_31 : f32 to vector<8x128xf32>
      %88 = arith.select %84, %65, %87 : vector<8x128xi1>, vector<8x128xf32>
      %cst_32 = arith.constant 0.000000e+00 : f32
      %89 = vector.broadcast %cst_32 : f32 to vector<8x128xf32>
      %90 = arith.select %84, %68, %89 : vector<8x128xi1>, vector<8x128xf32>
      %c0_33 = arith.constant 0 : index
      %c0_34 = arith.constant 0 : index
      %c0_35 = arith.constant 0 : index
      %c0_36 = arith.constant 0 : index
      %91 = vector.load %arg3[%c0_33, %c0_34, %c0_35, %c0_36] : memref<1x3x8x128xf32, #tpu.memory_space<vmem>>, vector<1x1x8x128xf32>
      %92 = vector.shape_cast %91 : vector<1x1x8x128xf32> to vector<8x128xf32>
      %93 = vector.shape_cast %86 : vector<8x128xf32> to vector<1x8x128xf32>
      %cst_37 = arith.constant dense<0.000000e+00> : vector<8x128xf32>
      %94 = vector.multi_reduction <add>, %93, %cst_37 [0] : vector<1x8x128xf32> to vector<8x128xf32>
      %95 = arith.addf %92, %94 : vector<8x128xf32>
      %c0_38 = arith.constant 0 : index
      %c0_39 = arith.constant 0 : index
      %c0_40 = arith.constant 0 : index
      %c0_41 = arith.constant 0 : index
      %96 = vector.load %arg3[%c0_38, %c0_39, %c0_40, %c0_41] : memref<1x3x8x128xf32, #tpu.memory_space<vmem>>, vector<1x1x8x128xf32>
      %97 = vector.shape_cast %96 : vector<1x1x8x128xf32> to vector<8x128xf32>
      %98 = vector.shape_cast %95 : vector<8x128xf32> to vector<1x1x8x128xf32>
      tpu.vector_store %arg3[%c0_38, %c0_39, %c0_40, %c0_41], %98 {strides = array<i32>} : memref<1x3x8x128xf32, #tpu.memory_space<vmem>>, vector<1x1x8x128xf32>,
      %c0_42 = arith.constant 0 : index
      %c1_43 = arith.constant 1 : index
      %c0_44 = arith.constant 0 : index
      %c0_45 = arith.constant 0 : index
      %99 = vector.load %arg3[%c0_42, %c1_43, %c0_44, %c0_45] : memref<1x3x8x128xf32, #tpu.memory_space<vmem>>, vector<1x1x8x128xf32>
      %100 = vector.shape_cast %99 : vector<1x1x8x128xf32> to vector<8x128xf32>
      %101 = vector.shape_cast %88 : vector<8x128xf32> to vector<1x8x128xf32>
      %cst_46 = arith.constant dense<0.000000e+00> : vector<8x128xf32>
      %102 = vector.multi_reduction <add>, %101, %cst_46 [0] : vector<1x8x128xf32> to vector<8x128xf32>
      %103 = arith.addf %100, %102 : vector<8x128xf32>
      %c0_47 = arith.constant 0 : index
      %c1_48 = arith.constant 1 : index
      %c0_49 = arith.constant 0 : index
      %c0_50 = arith.constant 0 : index
      %104 = vector.load %arg3[%c0_47, %c1_48, %c0_49, %c0_50] : memref<1x3x8x128xf32, #tpu.memory_space<vmem>>, vector<1x1x8x128xf32>
      %105 = vector.shape_cast %104 : vector<1x1x8x128xf32> to vector<8x128xf32>
      %106 = vector.shape_cast %103 : vector<8x128xf32> to vector<1x1x8x128xf32>
      tpu.vector_store %arg3[%c0_47, %c1_48, %c0_49, %c0_50], %106 {strides = array<i32>} : memref<1x3x8x128xf32, #tpu.memory_space<vmem>>, vector<1x1x8x128xf32>,
      %c0_51 = arith.constant 0 : index
      %c2_52 = arith.constant 2 : index
      %c0_53 = arith.constant 0 : index
      %c0_54 = arith.constant 0 : index
      %107 = vector.load %arg3[%c0_51, %c2_52, %c0_53, %c0_54] : memref<1x3x8x128xf32, #tpu.memory_space<vmem>>, vector<1x1x8x128xf32>
      %108 = vector.shape_cast %107 : vector<1x1x8x128xf32> to vector<8x128xf32>
      %109 = vector.shape_cast %90 : vector<8x128xf32> to vector<1x8x128xf32>
      %cst_55 = arith.constant dense<0.000000e+00> : vector<8x128xf32>
      %110 = vector.multi_reduction <add>, %109, %cst_55 [0] : vector<1x8x128xf32> to vector<8x128xf32>
      %111 = arith.addf %108, %110 : vector<8x128xf32>
      %c0_56 = arith.constant 0 : index
      %c2_57 = arith.constant 2 : index
      %c0_58 = arith.constant 0 : index
      %c0_59 = arith.constant 0 : index
      %112 = vector.load %arg3[%c0_56, %c2_57, %c0_58, %c0_59] : memref<1x3x8x128xf32, #tpu.memory_space<vmem>>, vector<1x1x8x128xf32>
      %113 = vector.shape_cast %112 : vector<1x1x8x128xf32> to vector<8x128xf32>
      %114 = vector.shape_cast %111 : vector<8x128xf32> to vector<1x1x8x128xf32>
      tpu.vector_store %arg3[%c0_56, %c2_57, %c0_58, %c0_59], %114 {strides = array<i32>} : memref<1x3x8x128xf32, #tpu.memory_space<vmem>>, vector<1x1x8x128xf32>,
    } else {
    }
    return
  }
  func.func @transform_0(%arg0: i32, %arg1: i32) -> (i32, i32, i32, i32) {
    %c0_i32 = arith.constant 0 : i32
    %c0_i32_0 = arith.constant 0 : i32
    %c0_i32_1 = arith.constant 0 : i32
    return %arg0, %c0_i32, %arg1, %c0_i32_0 : i32, i32, i32, i32
  }
  func.func @transform_1(%arg0: i32, %arg1: i32) -> (i32, i32, i32, i32) {
    %c0_i32 = arith.constant 0 : i32
    %c0_i32_0 = arith.constant 0 : i32
    %c0_i32_1 = arith.constant 0 : i32
    %c0_i32_2 = arith.constant 0 : i32
    return %arg0, %c0_i32, %c0_i32_0, %c0_i32_1 : i32, i32, i32, i32
  }
}

</mosaic_0001>

<bundles_post_ra>
// kernel: tpu_custom_call.1
= control target key start
LH: loop header
LB: loop body
LE: loop exit
PB: predicated region body
PF: predicated region fallthrough
CT: control target
= control target key end

     0   :  { %6 = vsyncpa [#allocation3], 0  ;;  %s759_s0 = inlined_call_operand.hbm [shape: f32[2,3,8,128], index: 0, kind: input, shape index: {}]   ;;  %s760_s1 = inlined_call_operand.hbm [shape: f32[2,3,8,128], index: 1, kind: output, shape index: {}]  }
   0x1   :  { %8 = vsyncpa [#allocation3 + $0x1], 0 }
   0x2   :  { %9 = vsyncpa [#allocation4], 0 }
   0x3   :  { %11 = vsyncpa [#allocation4 + $0x1], 0  ;;  %s575_s6 = smov 0   ;;  %s577_s7 = smov 0  }
   0x4   :  { %s579_s8 = smov 0   ;;  %s581_s9 = smov 0  }
   0x5   :  { %s583_s10 = smov 0   ;;  %s585_s11 = smov 0  }
   0x6 LB: > { %s350_s12 = sadd.s32 4294967295, %s557_s11   ;;  %s351_s13 = sadd.s32 4294967294, %s557_s11   ;;  %s557_s11 = sphi %s585_s11, %s17_s11   ;;  %s553_s10 = sphi %s583_s10, %s775_s10   ;;  %s549_s9 = sphi %s581_s9, %s774_s9   ;;  %s545_s8 = sphi %s579_s8, %s773_s8   ;;  %s541_s7 = sphi %s577_s7, %s772_s7   ;;  %s537_s6 = sphi %s575_s6, %s771_s6  }
   0x7   : > { %s29_s14 = sadd.s32 1, %s553_s10  ;;  %s38_s15 = sadd.s32 1, %s545_s8 }
   0x8   : > { %p31_p0 = scmp.ge.s32.totalorder %s29_s14, 2  ;;  %p45_p1 = scmp.ne.s32.totalorder %s545_s8, %s541_s7 }
   0x9   : > { %p46_p2 = scmp.eq.s32.totalorder %s557_s11, 0  ;;  %p51_p3 = scmp.ne.s32.totalorder %s541_s7, %s537_s6 }
   0xa   : > { %s777_s14 = smov (%p31_p0, %s29_s14), 0  ;;  %p52_p5 = scmp.eq.s32.totalorder %s350_s12, 0 }
   0xb   : > { %p616_p4 = por %p46_p2, %p45_p1  ;;  %s33_s17 = ssub.s32 %s553_s10, %s777_s14 }
   0xc   : > { %p75_p6 = scmp.eq.s32.totalorder %s350_s12, 1  ;;  %p36_p7 = scmp.eq.s32.totalorder %s33_s17, 0 }
   0xd   : > { %p622_p8 = por %p52_p5, %p51_p3  ;;  %p81_p10 = scmp.eq.s32.totalorder %s351_s13, 1 }
   0xe   : > { %p626_p9 = por %p75_p6, %p45_p1  ;;  %p386_p13 = scmp.lt.s32.totalorder %s557_s11, 2 }
   0xf   : > { %s631_s20 = scalar_select %p36_p7, %s545_s8, %s38_s15  }
  0x10   : > { %s764_s19 = scalar_select %p626_p9, 1, 0 }
  0x11   : > { %p633_p11 = por %p81_p10, %p51_p3  ;;  %s101_s22 = sand.u32 1, %s545_s8  }
  0x12   : > { %s370_s23 = smul.u32 24, %s101_s22  ;;  %p643_p0 = pnand %p386_p13, %p616_p4 }
  0x13   : > { %s765_s21 = scalar_select %p633_p11, 1, 0 }
  0x14   : > { %s371_s24 = smul.u32 384, %s553_s10  ;;  %s105_s29 = scalar_lea.vmem [#allocation2], %s370_s23 }
  0x15   : > { %s113_s30 = sshll.u32 %s105_s29, 4  ;;  %s655_s2 = scalar_lea.sflag [#allocation3], %s101_s22  ;;  %s652_s30 = int_to_ptr.vmem [resolvable:$true] %s113_s30 }
  0x16   : > { %s650_s28 = scalar_lea.hbm %s759_s0, %s371_s24  ;;  %p447_p3 = pneg %p643_p0 }
  0x17   : > { %s445_s3 = scalar_lea.hbm %s650_s28, 384  ;;  %s450_s12 = scalar_lea.hbm %s759_s0, 768 }
  0x18   : > { %p446_p2 = scmp.ne.s32.totalorder %s650_s28, %s445_s3  ;;  %p451_p6 = scmp.lt.u32.totalorder %s650_s28, %s759_s0 }
  0x19   : > { %p452_p7 = scmp.lt.u32.totalorder %s450_s12, %s445_s3  ;;  %p454_p13 = scmp.lt.u32.totalorder %s445_s3, %s650_s28 }
  0x1a   : > { %p448_p4 = pnand %p447_p3, %p446_p2 }
  0x1b   : > { %p453_p10 = por %p452_p7, %p451_p6 }
  0x1c   : > { %p449_p5 = pneg %p448_p4 }
  0x1d   : > { %p455_p12 = por %p454_p13, %p453_p10 }
  0x1f   : > { %p456_p1 = pnand %p455_p12, %p449_p5 }
  0x21   : > { %459 = shalt.err (!%p456_p1)
}
  0x22   : > { %s460_s16 = scalar_lea.vmem %s652_s30, 384  ;;  %s559_s17 = smov [#allocation2]  }
  0x23   : > { %p461_p2 = scmp.ne.s32.totalorder %s652_s30, %s460_s16  ;;  %s465_s22 = sshll.u32 %s559_s17, 4  ;;  %s466_s22 = int_to_ptr.vmem [resolvable:$false] %s465_s22 }
  0x24   : > { %s467_s23 = scalar_lea.vmem %s466_s22, 768  ;;  %p468_p9 = scmp.lt.s32.totalorder %s652_s30, %s466_s22 }
  0x25   : > { %p463_p4 = pnand %p461_p2, %p447_p3  ;;  %p469_p6 = scmp.lt.s32.totalorder %s467_s23, %s460_s16 }
  0x27   : > { %p464_p11 = pneg %p463_p4  ;;  %p470_p7 = por %p469_p6, %p468_p9 }
  0x29   : > { %p471_p10 = pnand %p470_p7, %p464_p11 }
  0x2b   : > { %474 = shalt.err (!%p471_p10)
}
  0x2c   : > { %s560_s24 = smov 128   ;;  %s561_s26 = smov 8  }
  0x2d   : > { %381 = dma.hbm_to_vmem [thread:$0]  (!%p643_p0), %s650_s28, 384, %s652_s30, %s655_s2, %s560_s24, %s560_s24, %s561_s26  }
  0x2e   : > { %p121_p12 = scmp.lt.s32.totalorder %s557_s11, 3  ;;  %p767_p1 = scmp.ge.s32.totalorder %s557_s11, 1 }
  0x30   : > { %p122_p3 = pnand %p767_p1, %p121_p12 }
  0x31   : > { %s687_s27 = sand.u32 (!%p122_p3), 1, %s541_s7  }
  0x32   : > { %125 = sbr.rel (%p122_p3) target bundleno = 112 (0x70), region = 24  ;;  %s128_s3 = scalar_lea.sflag (!%p122_p3), [#allocation3], %s687_s27 }
  0x33   : > { %s372_s29 = smul.u32 (!%p122_p3), 24, %s687_s27 }
  0x35   : > { %s131_s4 = scalar_lea.vmem (!%p122_p3), [#allocation2], %s372_s29 }
  0x39   : > { %528 = dma.done.wait (%p622_p8), %s128_s3, 384  }
  0x3a   : > { %530 = vsyncadd (%p622_p8), %s128_s3, 4294966912  ;;  %v226_v0 = vlaneseq  ;;  %v157_v4 = vld [vmem:[%s131_s4] sm:$0xff]  ;;  %v356_v5 = vld [vmem:[%s131_s4 + $0x8] sm:$0xff]  ;;  %s696_s18 = scalar_lea.vmem [#allocation5], %s372_s29  ;;  %s373_s25 = smul.u32 384, %s549_s9 }
  0x3b   : > { %v357_v6 = vld [vmem:[%s131_s4 + $0x10] sm:$0xff]  ;;  %v162_v7 = vmax.f32 %v157_v4, %v356_v5  ;;  %v164_v8 = vmin.f32 %v157_v4, %v356_v5  ;;  %v173_v24 = vsub.f32 %v157_v4, %v356_v5  ;;  %s267_s28 = sshll.u32 %s696_s18, 4  ;;  %s254_s12 = scalar_lea.sflag [#allocation4], %s687_s27  ;;  %s704_s28 = int_to_ptr.vmem [resolvable:$true] %s267_s28 }
  0x3c   : > { %v227_v1 = vshrl.u32 %v226_v0, 7  ;;  %v229_v2 = vand.u32 127, %v226_v0  ;;  %v178_v25 = vsub.f32 %v357_v6, %v157_v4  ;;  %v182_v26 = vsub.f32 %v356_v5, %v357_v6  ;;  %s709_s5 = scalar_lea.hbm %s760_s1, %s373_s25  ;;  %s475_s13 = scalar_lea.vmem %s704_s28, 384 }
  0x3d   : > { %v163_v9 = vmax.f32 %v162_v7, %v357_v6  ;;  %v165_v10 = vmin.f32 %v164_v8, %v357_v6  ;;  %p476_p8 = scmp.ne.s32.totalorder %s704_s28, %s475_s13  ;;  %p768_p9 = scmp.ne.s32.totalorder %s764_s19, 0 }
  0x3e   : > { %v233_v3 = vmul.u32 128, %v227_v1  ;;  %s562_s9 = smov [#allocation5]  }
  0x3f   : > { %v166_v12 = vsub.f32 %v163_v9, %v165_v10  ;;  %v194_v13 = vadd.f32 1.0000002, %v163_v9  ;;  %v358_v14 = vadd.f32 -0.4, %v163_v9  ;;  %vm200_vm1 = vcmp.eq.f32.partialorder %v163_v9, -1.0  ;;  %p477_p11 = pnand %p476_p8, %p768_p9  ;;  %s479_s15 = sshll.u32 %s562_s9, 4  ;;  %s480_s15 = int_to_ptr.vmem [resolvable:$false] %s479_s15 }
  0x40   : > { %v234_v11 = vadd.s32 %v233_v3, %v229_v2  ;;  %vm172_vm2 = vcmp.eq.f32.partialorder %v357_v6, %v163_v9  ;;  %vm177_vm3 = vcmp.eq.f32.partialorder %v356_v5, %v163_v9  ;;  %vm187_vm5 = vcmp.eq.f32.partialorder %v157_v4, %v163_v9  ;;  %s481_s16 = scalar_lea.vmem %s480_s15, 768  ;;  %p482_p5 = scmp.lt.s32.totalorder %s704_s28, %s480_s15 }
  0x41   : > { %v167_v15 = vadd.f32 2e-07, %v166_v12  ;;  %441 = vrcp.f32 %v194_v13  ;;  %v204_v16 = vand.u32 2147483647, %v358_v14  ;;  %vm189_vm6 = vcmp.eq.f32.partialorder %v165_v10, %v163_v9  ;;  %p478_p0 = pneg %p477_p11  ;;  %p483_p13 = scmp.lt.s32.totalorder %s481_s16, %s475_s13 }
  0x42   : > { %vm235_vm0 = vcmp.lt.s32.totalorder %v234_v11, 256 }
  0x43   : > { %443 = vrcp.f32 %v167_v15  ;;  %v238_v17 = vsel %vm235_vm0, %v204_v16, 0.0  ;;  %p484_p2 = por %p483_p13, %p482_p5 }
  0x44   : > { %366 = vst [vmem:[%s696_s18 + $0x10] sm:$0xff] %v238_v17 }
  0x45   : > { %p485_p4 = pnand %p484_p2, %p478_p0 }
  0x4b   : > { %v442_v18 = vpop.eup %441 }
  0x4c   : > { %v196_v20 = vmul.f32 %v442_v18, %v194_v13 }
  0x4d   : > { %v444_v19 = vpop.eup %443 }
  0x4e   : > { %v169_v21 = vmul.f32 %v444_v19, %v167_v15  ;;  %v197_v22 = vsub.f32 2.0, %v196_v20 }
  0x50   : > { %v170_v23 = vsub.f32 2.0, %v169_v21  ;;  %v198_v27 = vmul.f32 %v442_v18, %v197_v22 }
  0x52   : > { %v171_v28 = vmul.f32 %v444_v19, %v170_v23  ;;  %v199_v29 = vmul.f32 %v198_v27, %v166_v12 }
  0x54   : > { %v174_v30 = vmul.f32 %v173_v24, %v171_v28  ;;  %v179_v31 = vmul.f32 %v178_v25, %v171_v28  ;;  %v183_v32 = vmul.f32 %v182_v26, %v171_v28  ;;  %v201_v33 = vsel %vm200_vm1, 0.0, %v199_v29 }
  0x55   : > { %v202_v37 = vsub.f32 1.0, %v201_v33 }
  0x56   : > { %v175_v34 = vadd.f32 4.0, %v174_v30  ;;  %v180_v35 = vadd.f32 2.0, %v179_v31  ;;  %vm184_vm4 = vcmp.lt.f32.partialorder %v183_v32, 0.0  ;;  %v185_v36 = vadd.f32 6.0, %v183_v32 }
  0x57   : > { %v237_v41 = vsel %vm235_vm0, %v202_v37, 0.0 }
  0x58   : > { %v176_v38 = vsel %vm172_vm2, %v175_v34, 0.0  ;;  %v186_v39 = vsel %vm184_vm4, %v185_v36, %v183_v32  ;;  %364 = vst [vmem:[%s696_s18 + $0x8] sm:$0xff] %v237_v41 }
  0x59   : > { %v181_v40 = vsel %vm177_vm3, %v180_v35, %v176_v38 }
  0x5a   : > { %v188_v42 = vsel %vm187_vm5, %v186_v39, %v181_v40 }
  0x5b   : > { %v190_v43 = vsel %vm189_vm6, 0.0, %v188_v42 }
  0x5c   : > { %v191_v44 = vmul.f32 0.16666667, %v190_v43 }
  0x5e   : > { %vm192_vm7 = vcmp.lt.f32.partialorder %v191_v44, 0.03 }
  0x5f   : > { %v193_v45 = vsel %vm192_vm7, 0.0, %v191_v44 }
  0x60   : > { %v236_v46 = vsel %vm235_vm0, %v193_v45, 0.0 }
  0x61   : > { %242 = vst [vmem:[%s696_s18] sm:$0xff] %v236_v46 }
  0x62   : > { %488 = shalt.err (!%p485_p4)
}
  0x63   : > { %s489_s17 = scalar_lea.hbm %s709_s5, 384  ;;  %s493_s24 = scalar_lea.hbm %s760_s1, 768 }
  0x64   : > { %p490_p6 = scmp.ne.s32.totalorder %s709_s5, %s489_s17  ;;  %p494_p12 = scmp.lt.u32.totalorder %s709_s5, %s760_s1 }
  0x65   : > { %p495_p1 = scmp.lt.u32.totalorder %s493_s24, %s489_s17  ;;  %p497_p8 = scmp.lt.u32.totalorder %s489_s17, %s709_s5 }
  0x66   : > { %p491_p7 = pnand %p490_p6, %p768_p9 }
  0x67   : > { %p496_p3 = por %p495_p1, %p494_p12 }
  0x68   : > { %p492_p10 = pneg %p491_p7 }
  0x69   : > { %p498_p11 = por %p497_p8, %p496_p3 }
  0x6b   : > { %p499_p0 = pnand %p498_p11, %p492_p10 }
  0x6d   : > { %502 = shalt.err (!%p499_p0)
}
  0x6e   : > { %s563_s3 = smov 128   ;;  %s564_s4 = smov 8  }
  0x6f   : > { %376 = dma.vmem_to_hbm [thread:$0]  (%p768_p9), %s704_s28, 384, %s709_s5, %s254_s12, %s563_s3, %s563_s3, %s564_s4  }
  0x70 PF: > { %s282_s18 = sand.u32 1, %s537_s6   ;;  %p769_p5 = scmp.ne.s32.totalorder %s765_s21, 0 }
  0x71   : > { %p770_p13 = scmp.ge.s32.totalorder %s557_s11, 2  ;;  %s283_s25 = scalar_lea.sflag [#allocation4], %s282_s18 }
  0x73   : > { %p383_p2 = pnand %p770_p13, %p769_p5 }
  0x75   : > { %532 = dma.done.wait (!%p383_p2), %s283_s25, 384  }
  0x76   : > { %534 = vsyncadd (!%p383_p2), %s283_s25, 4294966912  ;;  %s17_s11 = sadd.s32 1, %s557_s11   ;;  %s771_s6 = smov %s541_s7 }
  0x77   : > { %p14_p4 = scmp.ge.s32.totalorder %s17_s11, 4   ;;  %s772_s7 = smov %s545_s8 }
  0x78   : > { %s773_s8 = smov %s631_s20  ;;  %s774_s9 = smov %s553_s10 }
  0x79   : > { %s775_s10 = smov %s777_s14  ;;  %16 = sbr.rel (!%p14_p4) target bundleno = 6 (0x6), region = 87 }
  0x80   :  { %288 = vsyncpa [#allocation3], 1 }
  0x81   :  { %290 = vsyncpa [#allocation3 + $0x1], 1 }
  0x82   :  { %291 = vsyncpa [#allocation4], 1 }
  0x83   :  { %293 = vsyncpa [#allocation4 + $0x1], 1 }

</bundles_post_ra>
